<compile_context>
chip_gen: v7x
topology: tpu7x:2x2x1
jax: 0.10.0
libtpu: 0.0.40
codegen_flags: <defaults>
</compile_context>

<pallas_src>
import functools

import jax
import jax.numpy as jnp
from jax import lax
from jax.experimental import pallas as pl
from jax.experimental.pallas import tpu as pltpu


def _round_up(x, m):
    return (x + m - 1) // m * m


def actor_kernel(x_ref, w1_ref, w2_ref, wh_ref, b1_ref, b2_ref, bh_ref,
                 out_ref, *, action_dim):
    # Layer 1: Linear + ReLU (bf16 MXU inputs, f32 accumulate + f32 epilogue).
    x = x_ref[...].astype(w1_ref.dtype)
    h1 = jnp.dot(x, w1_ref[...], preferred_element_type=jnp.float32)
    h1 = jnp.maximum(h1 + b1_ref[...], 0.0)

    # Layer 2: Linear + ReLU.
    h2 = jnp.dot(h1.astype(w2_ref.dtype), w2_ref[...],
                 preferred_element_type=jnp.float32)
    h2 = jnp.maximum(h2 + b2_ref[...], 0.0)

    # Fused, lane-padded heads: [mean_pre | log_std_pre | zero pad] in (tb, Ap).
    heads = jnp.dot(h2.astype(wh_ref.dtype), wh_ref[...],
                    preferred_element_type=jnp.float32)
    heads = heads + bh_ref[...]

    # tanh on the first A lanes, clamp(-20, 2) on the rest; lane-iota select
    # keeps the single lane-dense (unmasked) store.  Padded lanes are zeros
    # (zero weight columns + zero bias) and are sliced off by the wrapper.
    lane = lax.broadcasted_iota(jnp.int32, heads.shape, 1)
    out_ref[...] = jnp.where(lane < action_dim,
                             jnp.tanh(heads),
                             jnp.clip(heads, -20.0, 2.0))


def pack_params(params, *, weight_dtype=jnp.bfloat16, lane_multiple=128):
    """One-time packing: fuse + lane-pad the head weights/bias to a 128-multiple
    width and cast the weights to the MXU input dtype.  Biases stay f32."""
    w1, b1, w2, b2, wm, bm, ws, bs = params
    A = wm.shape[1]
    Ap = _round_up(2 * A, lane_multiple)
    wh = jnp.pad(jnp.concatenate([wm, ws], axis=1), ((0, 0), (0, Ap - 2 * A)))
    bh = jnp.pad(jnp.concatenate([bm, bs], axis=1), ((0, 0), (0, Ap - 2 * A)))
    return (w1.astype(weight_dtype), w2.astype(weight_dtype),
            wh.astype(weight_dtype),
            b1.astype(jnp.float32), b2.astype(jnp.float32),
            bh.astype(jnp.float32), A)


def actor_forward(state, packed_params, *, batch_tile=256):
    """state: (B, state_dim) f32.  Returns (action_mean, action_log_std)."""
    w1, w2, wh, b1, b2, bh, action_dim = packed_params
    B, S = state.shape
    H = w1.shape[1]
    Ap = wh.shape[1]
    A = action_dim

    # Balanced, sublane-aligned batch tiles (< 8 rows of waste per tile).
    cap = max(8, _round_up(batch_tile, 8))
    n_tiles = max(1, pl.cdiv(B, cap))
    tb = _round_up(pl.cdiv(B, n_tiles), 8)
    grid = (pl.cdiv(B, tb),)

    # VMEM footprint (weights possibly double-buffered on fallback, x/out
    # double-buffered, f32+bf16 activation temporaries) plus generous slack
    # for (8,128) tile padding and compiler-internal scratch.
    w_bytes = sum(int(a.size) * a.dtype.itemsize for a in (w1, w2, wh, b1, b2, bh))
    act_bytes = tb * (S + Ap + 4 * H) * 4
    vmem_limit = min(int(2 * w_bytes + 2 * act_bytes) + (16 << 20), 100 << 20)

    cost = pl.CostEstimate(
        flops=2 * B * (S * H + H * H + H * Ap),
        transcendentals=B * Ap,
        bytes_accessed=B * S * 4 + w_bytes + B * Ap * 4,
    )

    kernel = functools.partial(actor_kernel, action_dim=A)

    def run(single_buffer_weights):
        def resident_spec(shape):
            # Constant-index operands are fetched once; single-buffer them so
            # large hidden_dim weights do not get a useless second VMEM copy.
            if single_buffer_weights:
                return pl.BlockSpec(shape, lambda i: (0, 0),
                                    pipeline_mode=pl.Buffered(1))
            return pl.BlockSpec(shape, lambda i: (0, 0))

        return pl.pallas_call(
            kernel,
            out_shape=jax.ShapeDtypeStruct((B, Ap), jnp.float32),
            grid=grid,
            in_specs=[
                pl.BlockSpec((tb, S), lambda i: (i, 0)),   # state: batch-tiled
                resident_spec((S, H)),                     # w1 (bf16, resident)
                resident_spec((H, H)),                     # w2 (bf16, resident)
                resident_spec((H, Ap)),                    # fused head weight
                resident_spec((1, H)),                     # b1 (f32)
                resident_spec((1, H)),                     # b2 (f32)
                resident_spec((1, Ap)),                    # fused head bias
            ],
            out_specs=pl.BlockSpec((tb, Ap), lambda i: (i, 0)),  # lane-dense slab
            compiler_params=pltpu.CompilerParams(
                dimension_semantics=("parallel",),
                vmem_limit_bytes=vmem_limit),
            cost_estimate=cost,
        )(state, w1, w2, wh, b1, b2, bh)

    try:
        out = run(single_buffer_weights=True)
    except Exception:
        # pipeline_mode=pl.Buffered(1) unsupported on this jax version: fall
        # back to default double-buffered resident operands (same results).
        out = run(single_buffer_weights=False)

    mean = out[:, :A]
    log_std = out[:, A:2 * A]
    return mean, log_std


def init_params(key, state_dim, action_dim, hidden_dim):
    """Deterministic PyTorch-style uniform init; weights stored (in, out)."""
    def linear(key, fan_in, fan_out):
        kw, kb = jax.random.split(key)
        bound = 1.0 / jnp.sqrt(fan_in)
        w = jax.random.uniform(kw, (fan_in, fan_out), jnp.float32, -bound, bound)
        b = jax.random.uniform(kb, (1, fan_out), jnp.float32, -bound, bound)
        return w, b

    k1, k2, k3, k4 = jax.random.split(key, 4)
    w1, b1 = linear(k1, state_dim, hidden_dim)
    w2, b2 = linear(k2, hidden_dim, hidden_dim)
    wm, bm = linear(k3, hidden_dim, action_dim)
    ws, bs = linear(k4, hidden_dim, action_dim)
    return (w1, b1, w2, b2, wm, bm, ws, bs)


def actor_forward_ref(state, params, dot_dtype=None):
    """Plain-JAX reference.  dot_dtype=jnp.bfloat16 mirrors the kernel's MXU
    numerics (bf16 dot inputs, f32 accumulation); None is the pure-f32 path."""
    w1, b1, w2, b2, wm, bm, ws, bs = params
    c = (lambda a: a.astype(dot_dtype)) if dot_dtype is not None else (lambda a: a)
    dot = lambda a, b: jnp.dot(c(a), c(b), preferred_element_type=jnp.float32)
    h = jnp.maximum(dot(state, w1) + b1, 0.0)
    h = jnp.maximum(dot(h, w2) + b2, 0.0)
    mean = jnp.tanh(dot(h, wm) + bm)
    log_std = jnp.clip(dot(h, ws) + bs, -20.0, 2.0)
    return mean, log_std


# TODO(synk): Actor.sample() (Normal.rsample + tanh-squashed log_prob) is not
# kernelized; only the deterministic forward() pass is implemented in Pallas.


if __name__ == "__main__":
    key = jax.random.PRNGKey(0)
    k_state, k_params, k_odd, k_big = jax.random.split(key, 4)

    batch = 8
    state_dim = 16
    action_dim = 4
    hidden_dim = 32

    params = init_params(k_params, state_dim, action_dim, hidden_dim)
    packed = pack_params(params)

    def check(state, batch_tile=256):
        mean, log_std = actor_forward(state, packed, batch_tile=batch_tile)
        jax.block_until_ready((mean, log_std))
        assert mean.shape == (state.shape[0], action_dim)
        assert log_std.shape == (state.shape[0], action_dim)
        # Numerics-matched reference (bf16 dot inputs, f32 accumulate).
        m_ref, s_ref = actor_forward_ref(state, params, dot_dtype=jnp.bfloat16)
        assert jnp.allclose(mean, m_ref, atol=1e-2, rtol=1e-2)
        assert jnp.allclose(log_std, s_ref, atol=1e-2, rtol=1e-2)
        # Semantic sanity vs. the full-f32 (PyTorch-equivalent) reference;
        # loose tolerance because the kernel uses bf16 MXU inputs.
        m32, s32 = actor_forward_ref(state, params)
        assert jnp.allclose(mean, m32, atol=1e-1, rtol=1e-1)
        assert jnp.allclose(log_std, s32, atol=1e-1, rtol=1e-1)

    # Single-tile path (batch multiple of 8).
    check(jax.random.normal(k_state, (batch, state_dim), jnp.float32))
    # Ragged batch (not a multiple of 8): boundary tile, no wrapper-side pad.
    check(jax.random.normal(k_odd, (11, state_dim), jnp.float32))
    # Multi-step grid (3 balanced tiles of 16) with VMEM-resident weights.
    check(jax.random.normal(k_big, (40, state_dim), jnp.float32), batch_tile=16)

    print("KERNEL_OK")
</pallas_src>

<mosaic_0001>
module attributes {stable_mosaic.version = 11 : i64} {
  func.func @actor_kernel(%arg0: i32, %arg1: memref<8x16xf32, #tpu.memory_space<vmem>>, %arg2: memref<16x32xbf16, #tpu.memory_space<vmem>>, %arg3: memref<32x32xbf16, #tpu.memory_space<vmem>>, %arg4: memref<32x128xbf16, #tpu.memory_space<vmem>>, %arg5: memref<1x32xf32, #tpu.memory_space<vmem>>, %arg6: memref<1x32xf32, #tpu.memory_space<vmem>>, %arg7: memref<1x128xf32, #tpu.memory_space<vmem>>, %arg8: memref<8x128xf32, #tpu.memory_space<vmem>>) attributes {dimension_semantics = [#tpu.dimension_semantics<parallel>], iteration_bounds = array<i64: 1>, scalar_prefetch = 0 : i64, scratch_operands = 0 : i64, tpu.core_type = #tpu.core_type<tc>, window_params = [{transform_indices = @transform_0, window_bounds = array<i64: 8, 16>}, {pipeline_mode = #tpu.pipeline_mode<synchronous>, transform_indices = @transform_1, window_bounds = array<i64: 16, 32>}, {pipeline_mode = #tpu.pipeline_mode<synchronous>, transform_indices = @transform_2, window_bounds = array<i64: 32, 32>}, {pipeline_mode = #tpu.pipeline_mode<synchronous>, transform_indices = @transform_3, window_bounds = array<i64: 32, 128>}, {pipeline_mode = #tpu.pipeline_mode<synchronous>, transform_indices = @transform_4, window_bounds = array<i64: 1, 32>}, {pipeline_mode = #tpu.pipeline_mode<synchronous>, transform_indices = @transform_5, window_bounds = array<i64: 1, 32>}, {pipeline_mode = #tpu.pipeline_mode<synchronous>, transform_indices = @transform_6, window_bounds = array<i64: 1, 128>}, {transform_indices = @transform_7, window_bounds = array<i64: 8, 128>}]} {
    %c0 = arith.constant 0 : index
    %c0_0 = arith.constant 0 : index
    %0 = vector.load %arg1[%c0, %c0_0] : memref<8x16xf32, #tpu.memory_space<vmem>>, vector<8x16xf32>
    %1 = arith.truncf %0 : vector<8x16xf32> to vector<8x16xbf16>
    %c0_1 = arith.constant 0 : index
    %c0_2 = arith.constant 0 : index
    %2 = vector.load %arg2[%c0_1, %c0_2] : memref<16x32xbf16, #tpu.memory_space<vmem>>, vector<16x32xbf16>
    %cst = arith.constant dense<0.000000e+00> : vector<8x32xf32>
    %3 = tpu.matmul %1, %2, %cst {dimension_numbers = #tpu.dot_dimension_numbers<[1], [0], [0], [1], [0, 0, 1, 1], [], []>} : vector<8x16xbf16>, vector<16x32xbf16>, vector<8x32xf32> -> vector<8x32xf32>
    %c0_3 = arith.constant 0 : index
    %c0_4 = arith.constant 0 : index
    %4 = vector.load %arg5[%c0_3, %c0_4] : memref<1x32xf32, #tpu.memory_space<vmem>>, vector<1x32xf32>
    %5 = vector.broadcast %4 : vector<1x32xf32> to vector<8x32xf32>
    %6 = arith.addf %3, %5 : vector<8x32xf32>
    %cst_5 = arith.constant 0.000000e+00 : f32
    %7 = vector.broadcast %cst_5 : f32 to vector<8x32xf32>
    %8 = arith.maximumf %6, %7 : vector<8x32xf32>
    %9 = arith.truncf %8 : vector<8x32xf32> to vector<8x32xbf16>
    %c0_6 = arith.constant 0 : index
    %c0_7 = arith.constant 0 : index
    %10 = vector.load %arg3[%c0_6, %c0_7] : memref<32x32xbf16, #tpu.memory_space<vmem>>, vector<32x32xbf16>
    %cst_8 = arith.constant dense<0.000000e+00> : vector<8x32xf32>
    %11 = tpu.matmul %9, %10, %cst_8 {dimension_numbers = #tpu.dot_dimension_numbers<[1], [0], [0], [1], [0, 0, 1, 1], [], []>} : vector<8x32xbf16>, vector<32x32xbf16>, vector<8x32xf32> -> vector<8x32xf32>
    %c0_9 = arith.constant 0 : index
    %c0_10 = arith.constant 0 : index
    %12 = vector.load %arg6[%c0_9, %c0_10] : memref<1x32xf32, #tpu.memory_space<vmem>>, vector<1x32xf32>
    %13 = vector.broadcast %12 : vector<1x32xf32> to vector<8x32xf32>
    %14 = arith.addf %11, %13 : vector<8x32xf32>
    %cst_11 = arith.constant 0.000000e+00 : f32
    %15 = vector.broadcast %cst_11 : f32 to vector<8x32xf32>
    %16 = arith.maximumf %14, %15 : vector<8x32xf32>
    %17 = arith.truncf %16 : vector<8x32xf32> to vector<8x32xbf16>
    %c0_12 = arith.constant 0 : index
    %c0_13 = arith.constant 0 : index
    %18 = vector.load %arg4[%c0_12, %c0_13] : memref<32x128xbf16, #tpu.memory_space<vmem>>, vector<32x128xbf16>
    %cst_14 = arith.constant dense<0.000000e+00> : vector<8x128xf32>
    %19 = tpu.matmul %17, %18, %cst_14 {dimension_numbers = #tpu.dot_dimension_numbers<[1], [0], [0], [1], [0, 0, 1, 1], [], []>} : vector<8x32xbf16>, vector<32x128xbf16>, vector<8x128xf32> -> vector<8x128xf32>
    %c0_15 = arith.constant 0 : index
    %c0_16 = arith.constant 0 : index
    %20 = vector.load %arg7[%c0_15, %c0_16] : memref<1x128xf32, #tpu.memory_space<vmem>>, vector<1x128xf32>
    %21 = vector.broadcast %20 : vector<1x128xf32> to vector<8x128xf32>
    %22 = arith.addf %19, %21 : vector<8x128xf32>
    %23 = tpu.iota {dimensions = array<i32: 1>} : vector<8x128xi32>
    %c4_i32 = arith.constant 4 : i32
    %24 = vector.broadcast %c4_i32 : i32 to vector<8x128xi32>
    %25 = arith.cmpi slt, %23, %24 : vector<8x128xi32>
    %26 = math.tanh %22 : vector<8x128xf32>
    %cst_17 = arith.constant -2.000000e+01 : f32
    %cst_18 = arith.constant 2.000000e+00 : f32
    %27 = vector.broadcast %cst_17 : f32 to vector<8x128xf32>
    %28 = arith.maximumf %27, %22 : vector<8x128xf32>
    %29 = vector.broadcast %cst_18 : f32 to vector<8x128xf32>
    %30 = arith.minimumf %29, %28 : vector<8x128xf32>
    %31 = arith.select %25, %26, %30 : vector<8x128xi1>, vector<8x128xf32>
    %c0_19 = arith.constant 0 : index
    %c0_20 = arith.constant 0 : index
    %32 = vector.load %arg8[%c0_19, %c0_20] : memref<8x128xf32, #tpu.memory_space<vmem>>, vector<8x128xf32>
    tpu.vector_store %arg8[%c0_19, %c0_20], %31 {strides = array<i32>} : memref<8x128xf32, #tpu.memory_space<vmem>>, vector<8x128xf32>,
    return
  }
  func.func @transform_0(%arg0: i32) -> (i32, i32) {
    %c0_i32 = arith.constant 0 : i32
    %c0_i32_0 = arith.constant 0 : i32
    return %arg0, %c0_i32 : i32, i32
  }
  func.func @transform_1(%arg0: i32) -> (i32, i32) {
    %c0_i32 = arith.constant 0 : i32
    %c0_i32_0 = arith.constant 0 : i32
    %c0_i32_1 = arith.constant 0 : i32
    return %c0_i32, %c0_i32_0 : i32, i32
  }
  func.func @transform_2(%arg0: i32) -> (i32, i32) {
    %c0_i32 = arith.constant 0 : i32
    %c0_i32_0 = arith.constant 0 : i32
    %c0_i32_1 = arith.constant 0 : i32
    return %c0_i32, %c0_i32_0 : i32, i32
  }
  func.func @transform_3(%arg0: i32) -> (i32, i32) {
    %c0_i32 = arith.constant 0 : i32
    %c0_i32_0 = arith.constant 0 : i32
    %c0_i32_1 = arith.constant 0 : i32
    return %c0_i32, %c0_i32_0 : i32, i32
  }
  func.func @transform_4(%arg0: i32) -> (i32, i32) {
    %c0_i32 = arith.constant 0 : i32
    %c0_i32_0 = arith.constant 0 : i32
    %c0_i32_1 = arith.constant 0 : i32
    return %c0_i32, %c0_i32_0 : i32, i32
  }
  func.func @transform_5(%arg0: i32) -> (i32, i32) {
    %c0_i32 = arith.constant 0 : i32
    %c0_i32_0 = arith.constant 0 : i32
    %c0_i32_1 = arith.constant 0 : i32
    return %c0_i32, %c0_i32_0 : i32, i32
  }
  func.func @transform_6(%arg0: i32) -> (i32, i32) {
    %c0_i32 = arith.constant 0 : i32
    %c0_i32_0 = arith.constant 0 : i32
    %c0_i32_1 = arith.constant 0 : i32
    return %c0_i32, %c0_i32_0 : i32, i32
  }
  func.func @transform_7(%arg0: i32) -> (i32, i32) {
    %c0_i32 = arith.constant 0 : i32
    %c0_i32_0 = arith.constant 0 : i32
    return %arg0, %c0_i32 : i32, i32
  }
}

module attributes {stable_mosaic.version = 11 : i64} {
  func.func @actor_kernel(%arg0: i32, %arg1: memref<8x16xf32, #tpu.memory_space<vmem>>, %arg2: memref<16x32xbf16, #tpu.memory_space<vmem>>, %arg3: memref<32x32xbf16, #tpu.memory_space<vmem>>, %arg4: memref<32x128xbf16, #tpu.memory_space<vmem>>, %arg5: memref<1x32xf32, #tpu.memory_space<vmem>>, %arg6: memref<1x32xf32, #tpu.memory_space<vmem>>, %arg7: memref<1x128xf32, #tpu.memory_space<vmem>>, %arg8: memref<8x128xf32, #tpu.memory_space<vmem>>) attributes {dimension_semantics = [#tpu.dimension_semantics<parallel>], iteration_bounds = array<i64: 1>, scalar_prefetch = 0 : i64, scratch_operands = 0 : i64, tpu.core_type = #tpu.core_type<tc>, window_params = [{transform_indices = @transform_0, window_bounds = array<i64: 8, 16>}, {pipeline_mode = #tpu.pipeline_mode<synchronous>, transform_indices = @transform_1, window_bounds = array<i64: 16, 32>}, {pipeline_mode = #tpu.pipeline_mode<synchronous>, transform_indices = @transform_2, window_bounds = array<i64: 32, 32>}, {pipeline_mode = #tpu.pipeline_mode<synchronous>, transform_indices = @transform_3, window_bounds = array<i64: 32, 128>}, {pipeline_mode = #tpu.pipeline_mode<synchronous>, transform_indices = @transform_4, window_bounds = array<i64: 1, 32>}, {pipeline_mode = #tpu.pipeline_mode<synchronous>, transform_indices = @transform_5, window_bounds = array<i64: 1, 32>}, {pipeline_mode = #tpu.pipeline_mode<synchronous>, transform_indices = @transform_6, window_bounds = array<i64: 1, 128>}, {transform_indices = @transform_7, window_bounds = array<i64: 8, 128>}]} {
    %c0 = arith.constant 0 : index
    %c0_0 = arith.constant 0 : index
    %0 = vector.load %arg1[%c0, %c0_0] : memref<8x16xf32, #tpu.memory_space<vmem>>, vector<8x16xf32>
    %1 = arith.truncf %0 : vector<8x16xf32> to vector<8x16xbf16>
    %c0_1 = arith.constant 0 : index
    %c0_2 = arith.constant 0 : index
    %2 = vector.load %arg2[%c0_1, %c0_2] : memref<16x32xbf16, #tpu.memory_space<vmem>>, vector<16x32xbf16>
    %cst = arith.constant dense<0.000000e+00> : vector<8x32xf32>
    %3 = tpu.matmul %1, %2, %cst {dimension_numbers = #tpu.dot_dimension_numbers<[1], [0], [0], [1], [0, 0, 1, 1], [], []>} : vector<8x16xbf16>, vector<16x32xbf16>, vector<8x32xf32> -> vector<8x32xf32>
    %c0_3 = arith.constant 0 : index
    %c0_4 = arith.constant 0 : index
    %4 = vector.load %arg5[%c0_3, %c0_4] : memref<1x32xf32, #tpu.memory_space<vmem>>, vector<1x32xf32>
    %5 = vector.broadcast %4 : vector<1x32xf32> to vector<8x32xf32>
    %6 = arith.addf %3, %5 : vector<8x32xf32>
    %cst_5 = arith.constant 0.000000e+00 : f32
    %7 = vector.broadcast %cst_5 : f32 to vector<8x32xf32>
    %8 = arith.maximumf %6, %7 : vector<8x32xf32>
    %9 = arith.truncf %8 : vector<8x32xf32> to vector<8x32xbf16>
    %c0_6 = arith.constant 0 : index
    %c0_7 = arith.constant 0 : index
    %10 = vector.load %arg3[%c0_6, %c0_7] : memref<32x32xbf16, #tpu.memory_space<vmem>>, vector<32x32xbf16>
    %cst_8 = arith.constant dense<0.000000e+00> : vector<8x32xf32>
    %11 = tpu.matmul %9, %10, %cst_8 {dimension_numbers = #tpu.dot_dimension_numbers<[1], [0], [0], [1], [0, 0, 1, 1], [], []>} : vector<8x32xbf16>, vector<32x32xbf16>, vector<8x32xf32> -> vector<8x32xf32>
    %c0_9 = arith.constant 0 : index
    %c0_10 = arith.constant 0 : index
    %12 = vector.load %arg6[%c0_9, %c0_10] : memref<1x32xf32, #tpu.memory_space<vmem>>, vector<1x32xf32>
    %13 = vector.broadcast %12 : vector<1x32xf32> to vector<8x32xf32>
    %14 = arith.addf %11, %13 : vector<8x32xf32>
    %cst_11 = arith.constant 0.000000e+00 : f32
    %15 = vector.broadcast %cst_11 : f32 to vector<8x32xf32>
    %16 = arith.maximumf %14, %15 : vector<8x32xf32>
    %17 = arith.truncf %16 : vector<8x32xf32> to vector<8x32xbf16>
    %c0_12 = arith.constant 0 : index
    %c0_13 = arith.constant 0 : index
    %18 = vector.load %arg4[%c0_12, %c0_13] : memref<32x128xbf16, #tpu.memory_space<vmem>>, vector<32x128xbf16>
    %cst_14 = arith.constant dense<0.000000e+00> : vector<8x128xf32>
    %19 = tpu.matmul %17, %18, %cst_14 {dimension_numbers = #tpu.dot_dimension_numbers<[1], [0], [0], [1], [0, 0, 1, 1], [], []>} : vector<8x32xbf16>, vector<32x128xbf16>, vector<8x128xf32> -> vector<8x128xf32>
    %c0_15 = arith.constant 0 : index
    %c0_16 = arith.constant 0 : index
    %20 = vector.load %arg7[%c0_15, %c0_16] : memref<1x128xf32, #tpu.memory_space<vmem>>, vector<1x128xf32>
    %21 = vector.broadcast %20 : vector<1x128xf32> to vector<8x128xf32>
    %22 = arith.addf %19, %21 : vector<8x128xf32>
    %23 = tpu.iota {dimensions = array<i32: 1>} : vector<8x128xi32>
    %c4_i32 = arith.constant 4 : i32
    %24 = vector.broadcast %c4_i32 : i32 to vector<8x128xi32>
    %25 = arith.cmpi slt, %23, %24 : vector<8x128xi32>
    %26 = math.tanh %22 : vector<8x128xf32>
    %cst_17 = arith.constant -2.000000e+01 : f32
    %cst_18 = arith.constant 2.000000e+00 : f32
    %27 = vector.broadcast %cst_17 : f32 to vector<8x128xf32>
    %28 = arith.maximumf %27, %22 : vector<8x128xf32>
    %29 = vector.broadcast %cst_18 : f32 to vector<8x128xf32>
    %30 = arith.minimumf %29, %28 : vector<8x128xf32>
    %31 = arith.select %25, %26, %30 : vector<8x128xi1>, vector<8x128xf32>
    %c0_19 = arith.constant 0 : index
    %c0_20 = arith.constant 0 : index
    %32 = vector.load %arg8[%c0_19, %c0_20] : memref<8x128xf32, #tpu.memory_space<vmem>>, vector<8x128xf32>
    tpu.vector_store %arg8[%c0_19, %c0_20], %31 {strides = array<i32>} : memref<8x128xf32, #tpu.memory_space<vmem>>, vector<8x128xf32>,
    return
  }
  func.func @transform_0(%arg0: i32) -> (i32, i32) {
    %c0_i32 = arith.constant 0 : i32
    %c0_i32_0 = arith.constant 0 : i32
    return %arg0, %c0_i32 : i32, i32
  }
  func.func @transform_1(%arg0: i32) -> (i32, i32) {
    %c0_i32 = arith.constant 0 : i32
    %c0_i32_0 = arith.constant 0 : i32
    %c0_i32_1 = arith.constant 0 : i32
    return %c0_i32, %c0_i32_0 : i32, i32
  }
  func.func @transform_2(%arg0: i32) -> (i32, i32) {
    %c0_i32 = arith.constant 0 : i32
    %c0_i32_0 = arith.constant 0 : i32
    %c0_i32_1 = arith.constant 0 : i32
    return %c0_i32, %c0_i32_0 : i32, i32
  }
  func.func @transform_3(%arg0: i32) -> (i32, i32) {
    %c0_i32 = arith.constant 0 : i32
    %c0_i32_0 = arith.constant 0 : i32
    %c0_i32_1 = arith.constant 0 : i32
    return %c0_i32, %c0_i32_0 : i32, i32
  }
  func.func @transform_4(%arg0: i32) -> (i32, i32) {
    %c0_i32 = arith.constant 0 : i32
    %c0_i32_0 = arith.constant 0 : i32
    %c0_i32_1 = arith.constant 0 : i32
    return %c0_i32, %c0_i32_0 : i32, i32
  }
  func.func @transform_5(%arg0: i32) -> (i32, i32) {
    %c0_i32 = arith.constant 0 : i32
    %c0_i32_0 = arith.constant 0 : i32
    %c0_i32_1 = arith.constant 0 : i32
    return %c0_i32, %c0_i32_0 : i32, i32
  }
  func.func @transform_6(%arg0: i32) -> (i32, i32) {
    %c0_i32 = arith.constant 0 : i32
    %c0_i32_0 = arith.constant 0 : i32
    %c0_i32_1 = arith.constant 0 : i32
    return %c0_i32, %c0_i32_0 : i32, i32
  }
  func.func @transform_7(%arg0: i32) -> (i32, i32) {
    %c0_i32 = arith.constant 0 : i32
    %c0_i32_0 = arith.constant 0 : i32
    return %arg0, %c0_i32 : i32, i32
  }
}

</mosaic_0001>

<bundles_post_ra>
// kernel: tpu_custom_call.1
= control target key start
LH: loop header
LB: loop body
LE: loop exit
PB: predicated region body
PF: predicated region fallthrough
CT: control target
= control target key end

     0   :  { %12 = vsyncpa [#allocation3], 0  ;;  %s606_s0 = inlined_call_operand.hbm [shape: f32[8,16], index: 0, kind: input, shape index: {}]   ;;  %s607_s1 = inlined_call_operand.hbm [shape: bf16[16,32], index: 1, kind: input, shape index: {}]   ;;  %s608_s2 = inlined_call_operand.hbm [shape: bf16[32,32], index: 2, kind: input, shape index: {}]   ;;  %s609_s3 = inlined_call_operand.hbm [shape: bf16[32,128], index: 3, kind: input, shape index: {}]   ;;  %s610_s4 = inlined_call_operand.vmem [shape: f32[1,32], index: 4, kind: input, shape index: {}]   ;;  %s611_s5 = inlined_call_operand.vmem [shape: f32[1,32], index: 5, kind: input, shape index: {}]   ;;  %s612_s6 = inlined_call_operand.vmem [shape: f32[1,128], index: 6, kind: input, shape index: {}]   ;;  %s613_s7 = inlined_call_operand.hbm [shape: f32[8,128], index: 7, kind: output, shape index: {}]  }
   0x1   :  { %13 = vsyncpa [#allocation6], 0 }
   0x2   :  { %14 = vsyncpa [#allocation9], 0 }
   0x3   :  { %15 = vsyncpa [#allocation4], 0  ;;  %s479_s24 = smov [#allocation5]   ;;  %s361_s28 = scalar_lea.hbm %s607_s1, 128 }
   0x4   :  { %s31_s25 = sshll.u32 %s479_s24, 4  ;;  %p362_p0 = scmp.ne.s32.totalorder %s607_s1, %s361_s28  ;;  %s32_s25 = int_to_ptr.vmem [resolvable:$true] %s31_s25 }
   0x5   :  { %p365_p1 = scmp.lt.u32.totalorder %s361_s28, %s607_s1 }
   0x7   :  { %p367_p2 = pnand %p365_p1, %p362_p0 }
   0x9   :  { %370 = shalt.err (!%p367_p2)
}
   0xa   :  { %s371_s10 = scalar_lea.vmem %s32_s25, 128  ;;  %p376_p4 = scmp.lt.s32.totalorder %s32_s25, %s32_s25 }
   0xb   :  { %p372_p3 = scmp.ne.s32.totalorder %s32_s25, %s371_s10  ;;  %p377_p5 = scmp.lt.s32.totalorder %s371_s10, %s371_s10 }
   0xd   :  { %p378_p6 = por %p377_p5, %p376_p4 }
   0xf   :  { %p379_p7 = pnand %p378_p6, %p372_p3 }
  0x11   :  { %382 = shalt.err (!%p379_p7)
}
  0x12   :  { %s480_s11 = smov 64   ;;  %s481_s12 = smov 4  }
  0x13   :  { %37 = dma.hbm_to_vmem [thread:$0]  %s607_s1, 128, %s32_s25, [#allocation6], %s480_s11, %s480_s11, %s481_s12  }
  0x14   :  { %s482_s15 = smov [#allocation2]   ;;  %s483_s17 = smov [#allocation7]  }
  0x15   :  { %s22_s16 = sshll.u32 %s482_s15, 4  ;;  %s43_s18 = sshll.u32 %s483_s17, 4  ;;  %s23_s16 = int_to_ptr.vmem [resolvable:$true] %s22_s16  ;;  %s44_s18 = int_to_ptr.vmem [resolvable:$true] %s43_s18 }
  0x16   :  { %s383_s21 = scalar_lea.hbm %s606_s0, 128 }
  0x17   :  { %p384_p8 = scmp.ne.s32.totalorder %s606_s0, %s383_s21  ;;  %p387_p9 = scmp.lt.u32.totalorder %s383_s21, %s606_s0 }
  0x19   :  { %p389_p10 = pnand %p387_p9, %p384_p8 }
  0x1b   :  { %392 = shalt.err (!%p389_p10)
}
  0x1c   :  { %s393_s1 = scalar_lea.vmem %s23_s16, 128  ;;  %p398_p12 = scmp.lt.s32.totalorder %s23_s16, %s23_s16 }
  0x1d   :  { %p394_p11 = scmp.ne.s32.totalorder %s23_s16, %s393_s1  ;;  %p399_p13 = scmp.lt.s32.totalorder %s393_s1, %s393_s1 }
  0x1f   :  { %p400_p0 = por %p399_p13, %p398_p12 }
  0x21   :  { %p401_p1 = pnand %p400_p0, %p394_p11 }
  0x23   :  { %404 = shalt.err (!%p401_p1)
}
  0x24   :  { %25 = dma.hbm_to_vmem [thread:$0]  %s606_s0, 128, %s23_s16, [#allocation3]  }
  0x25   :  { %s405_s30 = scalar_lea.hbm %s608_s2, 256 }
  0x26   :  { %p406_p2 = scmp.ne.s32.totalorder %s608_s2, %s405_s30  ;;  %p409_p3 = scmp.lt.u32.totalorder %s405_s30, %s608_s2 }
  0x28   :  { %p411_p4 = pnand %p409_p3, %p406_p2 }
  0x2a   :  { %414 = shalt.err (!%p411_p4)
}
  0x2b   :  { %s415_s14 = scalar_lea.vmem %s44_s18, 256  ;;  %p420_p6 = scmp.lt.s32.totalorder %s44_s18, %s44_s18 }
  0x2c   :  { %p416_p5 = scmp.ne.s32.totalorder %s44_s18, %s415_s14  ;;  %p421_p7 = scmp.lt.s32.totalorder %s415_s14, %s415_s14 }
  0x2e   :  { %p422_p8 = por %p421_p7, %p420_p6 }
  0x30   :  { %p423_p9 = pnand %p422_p8, %p416_p5 }
  0x32   :  { %426 = shalt.err (!%p423_p9)
}
  0x33   :  { %49 = dma.hbm_to_vmem [thread:$0]  %s608_s2, 256, %s44_s18, [#allocation6], %s480_s11, %s480_s11, %s481_s12  }
  0x34   :  { %s484_s16 = smov [#allocation8]   ;;  %s427_s21 = scalar_lea.hbm %s609_s3, 256 }
  0x35   :  { %s55_s17 = sshll.u32 %s484_s16, 4  ;;  %p428_p10 = scmp.ne.s32.totalorder %s609_s3, %s427_s21  ;;  %s56_s17 = int_to_ptr.vmem [resolvable:$true] %s55_s17 }
  0x36   :  { %p431_p11 = scmp.lt.u32.totalorder %s427_s21, %s609_s3 }
  0x38   :  { %p433_p12 = pnand %p431_p11, %p428_p10 }
  0x3a   :  { %436 = shalt.err (!%p433_p12)
}
  0x3b   :  { %s437_s1 = scalar_lea.vmem %s56_s17, 256  ;;  %p442_p0 = scmp.lt.s32.totalorder %s56_s17, %s56_s17 }
  0x3c   :  { %p438_p13 = scmp.ne.s32.totalorder %s56_s17, %s437_s1  ;;  %p443_p1 = scmp.lt.s32.totalorder %s437_s1, %s437_s1 }
  0x3e   :  { %p444_p2 = por %p443_p1, %p442_p0 }
  0x40   :  { %p445_p3 = pnand %p444_p2, %p438_p13 }
  0x42   :  { %448 = shalt.err (!%p445_p3)
}
  0x43   :  { %61 = dma.hbm_to_vmem [thread:$0]  %s609_s3, 256, %s56_s17, [#allocation9], %s480_s11, %s480_s11, %s481_s12  }
  0x44   :  { %471 = dma.done.wait [#allocation3], 128  }
  0x45   :  { %472 = vsyncadd [#allocation3], 4294967168 }
  0x46   :  { %473 = dma.done.wait [#allocation6], 384  }
  0x47   :  { %474 = vsyncadd [#allocation6], 4294966912 }
  0x48   :  { %475 = dma.done.wait [#allocation9], 256  }
  0x49   :  { %476 = vsyncadd [#allocation9], 4294967040  ;;  %v485_v0 = vmov 0.0   ;;  %vm486_vm0 = vmmov 0   ;;  %v354_v1 = vld [vmem:[#allocation5] sm:$0xff]   ;;  %v81_v2 = vld [vmem:[#allocation2] sm:$0xff]  ;;  %v279_v30 = vlaneseq }
  0x4a   :  { %323 = vmatprep.subr.bf16.mxu0 %v485_v0  ;;  %325 = vmatprep.mubr.msk.bf16.mxu0 %vm486_vm0, %v485_v0  ;;  %vm98_vm1 = vcmask 130048   ;;  %v82_v3 = vpack.c.bf16 %v81_v2, %v81_v2  ;;  %v355_v4 = vld [vmem:[#allocation7] sm:$0xff]   ;;  %v356_v5 = vld [vmem:[#allocation7 + $0x8] sm:$0xff]   ;;  %v357_v6 = vld [vmem:[#allocation8] sm:$0xff]   ;;  %vm167_vm2 = vcmask 261120  }
  0x4b   :  { %329 = vmatprep.subr.bf16.mxu1 %v485_v0  ;;  %333 = vmatprep.mubr.msk.bf16.mxu1 %vm486_vm0, %v485_v0  ;;  %v304_v7 = vld [vmem:[%s610_s4] ss:$0 sm:$0xff]  ;;  %v358_v15 = vld [vmem:[#allocation8 + $0x8] sm:$0xff]   ;;  %v280_v31 = vand.u32 127, %v279_v30 }
  0x4c   :  { %324 = vmatpush3.bf16.msra.mxu0 %v354_v1  ;;  %330 = vmatpush3.bf16.msra.mxu1 %v355_v4  ;;  %v307_v16 = vld [vmem:[%s611_s5] ss:$0 sm:$0xff]  ;;  %s487_s5 = smov [#allocation10]  }
  0x4d   :  { %337 = vmatprep.subr.bf16.mxu0 %v485_v0  ;;  %331 = vmatprep.subr.bf16.mxu1 %v485_v0  ;;  %v311_v24 = vld [vmem:[%s612_s6] ss:$0 sm:$0xff]  ;;  %s293_s28 = sshll.u32 %s487_s5, 4  ;;  %vm281_vm3 = vcmp.lt.s32.totalorder %v280_v31, 4  ;;  %s294_s28 = int_to_ptr.vmem [resolvable:$true] %s293_s28 }
  0x4e   :  { %s449_s29 = scalar_lea.vmem %s294_s28, 128  ;;  %p454_p5 = scmp.lt.s32.totalorder %s294_s28, %s294_s28 }
  0x4f   :  { %326 = vmatmul.mubr.msk.bf16.vlgmr.msra.gmra.mrb[0].mxu0 %vm98_vm1, %v82_v3  ;;  %p450_p4 = scmp.ne.s32.totalorder %s294_s28, %s449_s29  ;;  %p455_p6 = scmp.lt.s32.totalorder %s449_s29, %s449_s29 }
  0x50   :  { %341 = vmatprep.mubr.msk.bf16.mxu0 %vm486_vm0, %v485_v0  ;;  %332 = vmatpush3.bf16.msra.mxu1 %v356_v5 }
  0x51   :  { %338 = vmatpush3.bf16.msra.mxu0 %v357_v6  ;;  %p456_p7 = por %p455_p6, %p454_p5 }
  0x52   :  { %339 = vmatprep.subr.bf16.mxu0 %v485_v0 }
  0x53   :  { %p457_p8 = pnand %p456_p7, %p450_p4 }
  0x55   :  { %340 = vmatpush3.bf16.msra.mxu0 %v358_v15 }
 0x122   :  { %v136_v8 = vpop.f32.mrb[0].mxu0 }
 0x123   :  { %v137_v9 = vadd.f32 %v304_v7, %v136_v8  ;;  %v327_v10 = vpop.f32.mrb[1].mxu0 }
 0x124   :  { %v139_v11 = vpop.f32.mrb[2].mxu0 }
 0x125   :  { %v142_v12 = vmax.f32 %v137_v9, 0.0  ;;  %v328_v13 = vpop.f32.mrb[3].mxu0 }
 0x127   :  { %v143_v14 = vpack.c.bf16 %v142_v12, %v142_v12 }
 0x129   :  { %334 = vmatmul.mubr.msk.bf16.vlgmr.msra.gmra.mrb[0].mxu1 %vm167_vm2, %v143_v14 }
 0x1fc   :  { %v205_v17 = vpop.f32.mrb[0].mxu1 }
 0x1fd   :  { %v206_v18 = vadd.f32 %v307_v16, %v205_v17  ;;  %v335_v19 = vpop.f32.mrb[1].mxu1 }
 0x1fe   :  { %v208_v20 = vpop.f32.mrb[2].mxu1 }
 0x1ff   :  { %v211_v21 = vmax.f32 %v206_v18, 0.0  ;;  %v336_v22 = vpop.f32.mrb[3].mxu1 }
 0x201   :  { %v212_v23 = vpack.c.bf16 %v211_v21, %v211_v21 }
 0x203   :  { %342 = vmatmul.mubr.msk.bf16.vlgmr.msra.gmra.mrb[4].mxu0 %vm167_vm2, %v212_v23 }
 0x2d6   :  { %v273_v25 = vpop.f32.mrb[4].mxu0 }
 0x2d7   :  { %v274_v26 = vadd.f32 %v311_v24, %v273_v25  ;;  %v343_v27 = vpop.f32.mrb[5].mxu0 }
 0x2d8   :  { %v276_v28 = vpop.f32.mrb[6].mxu0 }
 0x2d9   :  { %359 = vtanh.f32 %v274_v26  ;;  %v344_v29 = vpop.f32.mrb[7].mxu0  ;;  %v283_v32 = vmax.f32 %v274_v26, -20.0 }
 0x2db   :  { %v284_v33 = vmin.f32 %v283_v32, 2.0 }
 0x2e3   :  { %v360_v34 = vpop.eup %359 }
 0x2e4   :  { %v285_v35 = vsel %vm281_vm3, %v360_v34, %v284_v33 }
 0x2e5   :  { %286 = vst [vmem:[#allocation10] sm:$0xff] %v285_v35 }
 0x2e6   :  { %460 = shalt.err (!%p457_p8)
}
 0x2e7   :  { %s461_s8 = scalar_lea.hbm %s613_s7, 128 }
 0x2e8   :  { %p462_p9 = scmp.ne.s32.totalorder %s613_s7, %s461_s8  ;;  %p465_p10 = scmp.lt.u32.totalorder %s461_s8, %s613_s7 }
 0x2ea   :  { %p467_p11 = pnand %p465_p10, %p462_p9 }
 0x2ec   :  { %470 = shalt.err (!%p467_p11)
}
 0x2ed   :  { %296 = dma.vmem_to_hbm [thread:$0]  %s294_s28, 128, %s613_s7, [#allocation4]  }
 0x2ee   :  { %477 = dma.done.wait [#allocation4], 128  }
 0x2ef   :  { %478 = vsyncadd [#allocation4], 4294967168 }
 0x2f0   :  { %300 = vsyncpa [#allocation3], 1 }
 0x2f1   :  { %301 = vsyncpa [#allocation6], 1 }
 0x2f2   :  { %302 = vsyncpa [#allocation9], 1 }
 0x2f3   :  { %303 = vsyncpa [#allocation4], 1 }

// kernel: tpu_custom_call.1
= control target key start
LH: loop header
LB: loop body
LE: loop exit
PB: predicated region body
PF: predicated region fallthrough
CT: control target
= control target key end

     0   :  { %12 = vsyncpa [#allocation3], 0  ;;  %s606_s0 = inlined_call_operand.hbm [shape: f32[8,16], index: 0, kind: input, shape index: {}]   ;;  %s607_s1 = inlined_call_operand.hbm [shape: bf16[16,32], index: 1, kind: input, shape index: {}]   ;;  %s608_s2 = inlined_call_operand.hbm [shape: bf16[32,32], index: 2, kind: input, shape index: {}]   ;;  %s609_s3 = inlined_call_operand.hbm [shape: bf16[32,128], index: 3, kind: input, shape index: {}]   ;;  %s610_s4 = inlined_call_operand.vmem [shape: f32[1,32], index: 4, kind: input, shape index: {}]   ;;  %s611_s5 = inlined_call_operand.vmem [shape: f32[1,32], index: 5, kind: input, shape index: {}]   ;;  %s612_s6 = inlined_call_operand.vmem [shape: f32[1,128], index: 6, kind: input, shape index: {}]   ;;  %s613_s7 = inlined_call_operand.hbm [shape: f32[8,128], index: 7, kind: output, shape index: {}]  }
   0x1   :  { %13 = vsyncpa [#allocation6], 0 }
   0x2   :  { %14 = vsyncpa [#allocation9], 0 }
   0x3   :  { %15 = vsyncpa [#allocation4], 0  ;;  %s479_s24 = smov [#allocation5]   ;;  %s361_s28 = scalar_lea.hbm %s607_s1, 128 }
   0x4   :  { %s31_s25 = sshll.u32 %s479_s24, 4  ;;  %p362_p0 = scmp.ne.s32.totalorder %s607_s1, %s361_s28  ;;  %s32_s25 = int_to_ptr.vmem [resolvable:$true] %s31_s25 }
   0x5   :  { %p365_p1 = scmp.lt.u32.totalorder %s361_s28, %s607_s1 }
   0x7   :  { %p367_p2 = pnand %p365_p1, %p362_p0 }
   0x9   :  { %370 = shalt.err (!%p367_p2)
}
   0xa   :  { %s371_s10 = scalar_lea.vmem %s32_s25, 128  ;;  %p376_p4 = scmp.lt.s32.totalorder %s32_s25, %s32_s25 }
   0xb   :  { %p372_p3 = scmp.ne.s32.totalorder %s32_s25, %s371_s10  ;;  %p377_p5 = scmp.lt.s32.totalorder %s371_s10, %s371_s10 }
   0xd   :  { %p378_p6 = por %p377_p5, %p376_p4 }
   0xf   :  { %p379_p7 = pnand %p378_p6, %p372_p3 }
  0x11   :  { %382 = shalt.err (!%p379_p7)
}
  0x12   :  { %s480_s11 = smov 64   ;;  %s481_s12 = smov 4  }
  0x13   :  { %37 = dma.hbm_to_vmem [thread:$0]  %s607_s1, 128, %s32_s25, [#allocation6], %s480_s11, %s480_s11, %s481_s12  }
  0x14   :  { %s482_s15 = smov [#allocation2]   ;;  %s483_s17 = smov [#allocation7]  }
  0x15   :  { %s22_s16 = sshll.u32 %s482_s15, 4  ;;  %s43_s18 = sshll.u32 %s483_s17, 4  ;;  %s23_s16 = int_to_ptr.vmem [resolvable:$true] %s22_s16  ;;  %s44_s18 = int_to_ptr.vmem [resolvable:$true] %s43_s18 }
  0x16   :  { %s383_s21 = scalar_lea.hbm %s606_s0, 128 }
  0x17   :  { %p384_p8 = scmp.ne.s32.totalorder %s606_s0, %s383_s21  ;;  %p387_p9 = scmp.lt.u32.totalorder %s383_s21, %s606_s0 }
  0x19   :  { %p389_p10 = pnand %p387_p9, %p384_p8 }
  0x1b   :  { %392 = shalt.err (!%p389_p10)
}
  0x1c   :  { %s393_s1 = scalar_lea.vmem %s23_s16, 128  ;;  %p398_p12 = scmp.lt.s32.totalorder %s23_s16, %s23_s16 }
  0x1d   :  { %p394_p11 = scmp.ne.s32.totalorder %s23_s16, %s393_s1  ;;  %p399_p13 = scmp.lt.s32.totalorder %s393_s1, %s393_s1 }
  0x1f   :  { %p400_p0 = por %p399_p13, %p398_p12 }
  0x21   :  { %p401_p1 = pnand %p400_p0, %p394_p11 }
  0x23   :  { %404 = shalt.err (!%p401_p1)
}
  0x24   :  { %25 = dma.hbm_to_vmem [thread:$0]  %s606_s0, 128, %s23_s16, [#allocation3]  }
  0x25   :  { %s405_s30 = scalar_lea.hbm %s608_s2, 256 }
  0x26   :  { %p406_p2 = scmp.ne.s32.totalorder %s608_s2, %s405_s30  ;;  %p409_p3 = scmp.lt.u32.totalorder %s405_s30, %s608_s2 }
  0x28   :  { %p411_p4 = pnand %p409_p3, %p406_p2 }
  0x2a   :  { %414 = shalt.err (!%p411_p4)
}
  0x2b   :  { %s415_s14 = scalar_lea.vmem %s44_s18, 256  ;;  %p420_p6 = scmp.lt.s32.totalorder %s44_s18, %s44_s18 }
  0x2c   :  { %p416_p5 = scmp.ne.s32.totalorder %s44_s18, %s415_s14  ;;  %p421_p7 = scmp.lt.s32.totalorder %s415_s14, %s415_s14 }
  0x2e   :  { %p422_p8 = por %p421_p7, %p420_p6 }
  0x30   :  { %p423_p9 = pnand %p422_p8, %p416_p5 }
  0x32   :  { %426 = shalt.err (!%p423_p9)
}
  0x33   :  { %49 = dma.hbm_to_vmem [thread:$0]  %s608_s2, 256, %s44_s18, [#allocation6], %s480_s11, %s480_s11, %s481_s12  }
  0x34   :  { %s484_s16 = smov [#allocation8]   ;;  %s427_s21 = scalar_lea.hbm %s609_s3, 256 }
  0x35   :  { %s55_s17 = sshll.u32 %s484_s16, 4  ;;  %p428_p10 = scmp.ne.s32.totalorder %s609_s3, %s427_s21  ;;  %s56_s17 = int_to_ptr.vmem [resolvable:$true] %s55_s17 }
  0x36   :  { %p431_p11 = scmp.lt.u32.totalorder %s427_s21, %s609_s3 }
  0x38   :  { %p433_p12 = pnand %p431_p11, %p428_p10 }
  0x3a   :  { %436 = shalt.err (!%p433_p12)
}
  0x3b   :  { %s437_s1 = scalar_lea.vmem %s56_s17, 256  ;;  %p442_p0 = scmp.lt.s32.totalorder %s56_s17, %s56_s17 }
  0x3c   :  { %p438_p13 = scmp.ne.s32.totalorder %s56_s17, %s437_s1  ;;  %p443_p1 = scmp.lt.s32.totalorder %s437_s1, %s437_s1 }
  0x3e   :  { %p444_p2 = por %p443_p1, %p442_p0 }
  0x40   :  { %p445_p3 = pnand %p444_p2, %p438_p13 }
  0x42   :  { %448 = shalt.err (!%p445_p3)
}
  0x43   :  { %61 = dma.hbm_to_vmem [thread:$0]  %s609_s3, 256, %s56_s17, [#allocation9], %s480_s11, %s480_s11, %s481_s12  }
  0x44   :  { %471 = dma.done.wait [#allocation3], 128  }
  0x45   :  { %472 = vsyncadd [#allocation3], 4294967168 }
  0x46   :  { %473 = dma.done.wait [#allocation6], 384  }
  0x47   :  { %474 = vsyncadd [#allocation6], 4294966912 }
  0x48   :  { %475 = dma.done.wait [#allocation9], 256  }
  0x49   :  { %476 = vsyncadd [#allocation9], 4294967040  ;;  %v485_v0 = vmov 0.0   ;;  %vm486_vm0 = vmmov 0   ;;  %v354_v1 = vld [vmem:[#allocation5] sm:$0xff]   ;;  %v81_v2 = vld [vmem:[#allocation2] sm:$0xff]  ;;  %v279_v30 = vlaneseq }
  0x4a   :  { %323 = vmatprep.subr.bf16.mxu0 %v485_v0  ;;  %325 = vmatprep.mubr.msk.bf16.mxu0 %vm486_vm0, %v485_v0  ;;  %vm98_vm1 = vcmask 130048   ;;  %v82_v3 = vpack.c.bf16 %v81_v2, %v81_v2  ;;  %v355_v4 = vld [vmem:[#allocation7] sm:$0xff]   ;;  %v356_v5 = vld [vmem:[#allocation7 + $0x8] sm:$0xff]   ;;  %v357_v6 = vld [vmem:[#allocation8] sm:$0xff]   ;;  %vm167_vm2 = vcmask 261120  }
  0x4b   :  { %329 = vmatprep.subr.bf16.mxu1 %v485_v0  ;;  %333 = vmatprep.mubr.msk.bf16.mxu1 %vm486_vm0, %v485_v0  ;;  %v304_v7 = vld [vmem:[%s610_s4] ss:$0 sm:$0xff]  ;;  %v358_v15 = vld [vmem:[#allocation8 + $0x8] sm:$0xff]   ;;  %v280_v31 = vand.u32 127, %v279_v30 }
  0x4c   :  { %324 = vmatpush3.bf16.msra.mxu0 %v354_v1  ;;  %330 = vmatpush3.bf16.msra.mxu1 %v355_v4  ;;  %v307_v16 = vld [vmem:[%s611_s5] ss:$0 sm:$0xff]  ;;  %s487_s5 = smov [#allocation10]  }
  0x4d   :  { %337 = vmatprep.subr.bf16.mxu0 %v485_v0  ;;  %331 = vmatprep.subr.bf16.mxu1 %v485_v0  ;;  %v311_v24 = vld [vmem:[%s612_s6] ss:$0 sm:$0xff]  ;;  %s293_s28 = sshll.u32 %s487_s5, 4  ;;  %vm281_vm3 = vcmp.lt.s32.totalorder %v280_v31, 4  ;;  %s294_s28 = int_to_ptr.vmem [resolvable:$true] %s293_s28 }
  0x4e   :  { %s449_s29 = scalar_lea.vmem %s294_s28, 128  ;;  %p454_p5 = scmp.lt.s32.totalorder %s294_s28, %s294_s28 }
  0x4f   :  { %326 = vmatmul.mubr.msk.bf16.vlgmr.msra.gmra.mrb[0].mxu0 %vm98_vm1, %v82_v3  ;;  %p450_p4 = scmp.ne.s32.totalorder %s294_s28, %s449_s29  ;;  %p455_p6 = scmp.lt.s32.totalorder %s449_s29, %s449_s29 }
  0x50   :  { %341 = vmatprep.mubr.msk.bf16.mxu0 %vm486_vm0, %v485_v0  ;;  %332 = vmatpush3.bf16.msra.mxu1 %v356_v5 }
  0x51   :  { %338 = vmatpush3.bf16.msra.mxu0 %v357_v6  ;;  %p456_p7 = por %p455_p6, %p454_p5 }
  0x52   :  { %339 = vmatprep.subr.bf16.mxu0 %v485_v0 }
  0x53   :  { %p457_p8 = pnand %p456_p7, %p450_p4 }
  0x55   :  { %340 = vmatpush3.bf16.msra.mxu0 %v358_v15 }
 0x122   :  { %v136_v8 = vpop.f32.mrb[0].mxu0 }
 0x123   :  { %v137_v9 = vadd.f32 %v304_v7, %v136_v8  ;;  %v327_v10 = vpop.f32.mrb[1].mxu0 }
 0x124   :  { %v139_v11 = vpop.f32.mrb[2].mxu0 }
 0x125   :  { %v142_v12 = vmax.f32 %v137_v9, 0.0  ;;  %v328_v13 = vpop.f32.mrb[3].mxu0 }
 0x127   :  { %v143_v14 = vpack.c.bf16 %v142_v12, %v142_v12 }
 0x129   :  { %334 = vmatmul.mubr.msk.bf16.vlgmr.msra.gmra.mrb[0].mxu1 %vm167_vm2, %v143_v14 }
 0x1fc   :  { %v205_v17 = vpop.f32.mrb[0].mxu1 }
 0x1fd   :  { %v206_v18 = vadd.f32 %v307_v16, %v205_v17  ;;  %v335_v19 = vpop.f32.mrb[1].mxu1 }
 0x1fe   :  { %v208_v20 = vpop.f32.mrb[2].mxu1 }
 0x1ff   :  { %v211_v21 = vmax.f32 %v206_v18, 0.0  ;;  %v336_v22 = vpop.f32.mrb[3].mxu1 }
 0x201   :  { %v212_v23 = vpack.c.bf16 %v211_v21, %v211_v21 }
 0x203   :  { %342 = vmatmul.mubr.msk.bf16.vlgmr.msra.gmra.mrb[4].mxu0 %vm167_vm2, %v212_v23 }
 0x2d6   :  { %v273_v25 = vpop.f32.mrb[4].mxu0 }
 0x2d7   :  { %v274_v26 = vadd.f32 %v311_v24, %v273_v25  ;;  %v343_v27 = vpop.f32.mrb[5].mxu0 }
 0x2d8   :  { %v276_v28 = vpop.f32.mrb[6].mxu0 }
 0x2d9   :  { %359 = vtanh.f32 %v274_v26  ;;  %v344_v29 = vpop.f32.mrb[7].mxu0  ;;  %v283_v32 = vmax.f32 %v274_v26, -20.0 }
 0x2db   :  { %v284_v33 = vmin.f32 %v283_v32, 2.0 }
 0x2e3   :  { %v360_v34 = vpop.eup %359 }
 0x2e4   :  { %v285_v35 = vsel %vm281_vm3, %v360_v34, %v284_v33 }
 0x2e5   :  { %286 = vst [vmem:[#allocation10] sm:$0xff] %v285_v35 }
 0x2e6   :  { %460 = shalt.err (!%p457_p8)
}
 0x2e7   :  { %s461_s8 = scalar_lea.hbm %s613_s7, 128 }
 0x2e8   :  { %p462_p9 = scmp.ne.s32.totalorder %s613_s7, %s461_s8  ;;  %p465_p10 = scmp.lt.u32.totalorder %s461_s8, %s613_s7 }
 0x2ea   :  { %p467_p11 = pnand %p465_p10, %p462_p9 }
 0x2ec   :  { %470 = shalt.err (!%p467_p11)
}
 0x2ed   :  { %296 = dma.vmem_to_hbm [thread:$0]  %s294_s28, 128, %s613_s7, [#allocation4]  }
 0x2ee   :  { %477 = dma.done.wait [#allocation4], 128  }
 0x2ef   :  { %478 = vsyncadd [#allocation4], 4294967168 }
 0x2f0   :  { %300 = vsyncpa [#allocation3], 1 }
 0x2f1   :  { %301 = vsyncpa [#allocation6], 1 }
 0x2f2   :  { %302 = vsyncpa [#allocation9], 1 }
 0x2f3   :  { %303 = vsyncpa [#allocation4], 1 }

</bundles_post_ra>
